<compile_context>
chip_gen: v5e
topology: v5e:2x2
jax: 0.10.0
libtpu: 0.0.40
codegen_flags: <defaults>
</compile_context>

<pallas_src>
from functools import partial

import jax
import jax.numpy as jnp
from jax.experimental import pallas as pl
from jax.experimental.pallas import tpu as pltpu


_LANE = 128
_SUBLANE = 8
_MAX_SUB_ROWS = 512                 # inner compute chunk (rows per fori_loop step)
_MAX_BLOCK_ROWS = 32768             # cap on rows per DMA block
_VMEM_BUDGET = 24 * 1024 * 1024     # fits v7x's 64 MiB/TC VMEM and the 32 MiB scoped limit
_TEMP_HEADROOM = 6 * 1024 * 1024    # slack for in-kernel one-hots / iotas / spills


def _round_up(x, m):
    return ((x + m - 1) // m) * m


def _choose_tiling(n, c, itemsize, block_rows=None, sub_rows=None):
    """Pick (tile_n, sub_rows, num_blocks) for the row-streaming kernel."""
    c_pad = _round_up(c, _LANE)                 # lane padding of the logits in VMEM/HBM tiles
    row_bytes = c_pad * itemsize

    if block_rows is None:
        # One DMA block per grid step; the Pallas pipeline double-buffers it.
        per_buf = (_VMEM_BUDGET - _TEMP_HEADROOM) // 2
        block_rows = per_buf // row_bytes
    block_rows = max(_SUBLANE, min(int(block_rows), _MAX_BLOCK_ROWS))

    if sub_rows is None:
        # Inner compute chunk: bounds unrolled vector work and f32 one-hot temps.
        sub_rows = min(_MAX_SUB_ROWS, block_rows, _round_up(n, _SUBLANE))
        temp_rows = max(_SUBLANE, (2 * 1024 * 1024) // (4 * c_pad))
        sub_rows = min(sub_rows, temp_rows)
    sub_rows = int(sub_rows)
    if sub_rows >= _LANE:
        sub_rows = (sub_rows // _LANE) * _LANE  # lane-dense target blocks
    else:
        sub_rows = _round_up(sub_rows, _SUBLANE)

    n_pad = _round_up(n, sub_rows)
    tile_n = max(sub_rows, (block_rows // sub_rows) * sub_rows)
    tile_n = min(tile_n, n_pad)
    # Keep >= 2 grid blocks when the problem allows it so the "parallel" axis
    # actually gives both TensorCores work on v7x megacore.
    if pl.cdiv(n_pad, tile_n) < 2 and n_pad >= 2 * sub_rows:
        tile_n = _round_up(n_pad // 2, sub_rows)
    num_blocks = pl.cdiv(n_pad, tile_n)
    return tile_n, sub_rows, num_blocks


def _mce_kernel(x_ref, t_ref, out_ref, *, n_total, tile_n, sub_rows, n_chunks):
    i = pl.program_id(0)
    block_row0 = i * tile_n

    c = x_ref.shape[1]
    sub = sub_rows
    side = min(c, sub)                     # side of the small trace matrix

    # Loop-invariant index helpers, hoisted (JAX does not CSE broadcast_in_dim).
    col_ids = jax.lax.broadcasted_iota(jnp.int32, (sub, c), 1)     # class id per lane
    cls_rows = jax.lax.broadcasted_iota(jnp.int32, (c, sub), 0)    # class id per sublane
    lane_ids = jax.lax.broadcasted_iota(jnp.int32, (1, sub), 1)    # row id within a chunk
    eye = (jax.lax.broadcasted_iota(jnp.int32, (side, side), 0)
           == jax.lax.broadcasted_iota(jnp.int32, (side, side), 1)
           ).astype(jnp.float32)

    def body(j, acc):
        r0 = pl.multiple_of(j * sub, sub)
        x = x_ref[pl.ds(r0, sub), :]                               # (sub, C) native dtype
        t = t_ref[pl.ds(j, 1), :]                                  # (1, sub) int32, lane-major

        # First-occurrence argmax over the class (lane) axis, like torch.argmax.
        row_max = jnp.max(x, axis=1, keepdims=True)                # (sub, 1)
        cand = jnp.where(x == row_max, col_ids, jnp.int32(c))      # (sub, C)
        pred = jnp.min(cand, axis=1, keepdims=True)                # (sub, 1) int32

        # Rows past the global N (last partial block / chunk) are masked out.
        valid = (block_row0 + r0 + lane_ids) < n_total             # (1, sub) bool

        # Count matches with one small MXU contraction instead of a
        # lane<->sublane relayout of pred or targets:
        #   A[r, k] = [pred[r] == k]              (sub, C)  sublane-major one-hot
        #   B[k, r] = [t[r] == k] * valid[r]      (C, sub)  lane-major one-hot
        #   trace(B @ A) = sum_r valid[r] * [pred[r] == t[r]]
        a_hot = (col_ids == pred).astype(jnp.float32)              # (sub, C)
        b_hot = jnp.logical_and(cls_rows == t, valid).astype(jnp.float32)  # (C, sub)
        if c <= sub:
            prod = jnp.dot(b_hot, a_hot, preferred_element_type=jnp.float32)   # (C, C)
        else:
            prod = jnp.dot(a_hot, b_hot, preferred_element_type=jnp.float32)   # (sub, sub)
        diag = prod * eye
        matches = jnp.sum(jnp.sum(diag, axis=0, keepdims=True), axis=1, keepdims=True)
        n_valid = jnp.sum(valid.astype(jnp.float32), axis=1, keepdims=True)
        return acc + (n_valid - matches)                            # (1, 1) f32

    acc = jax.lax.fori_loop(0, n_chunks, body, jnp.zeros((1, 1), jnp.float32))
    # Lane-dense block write; the wrapper reads column 0.
    out_ref[...] = jnp.zeros((1, _LANE), jnp.float32) + acc


def mce_loss(inputs, targets, reduction="mean", *, block_rows=None, sub_rows=None):
    """inputs: (N, C) float logits; targets: (N,) integer class ids."""
    n, c = inputs.shape
    itemsize = jnp.dtype(inputs.dtype).itemsize
    tile_n, sub, num_blocks = _choose_tiling(n, c, itemsize, block_rows, sub_rows)
    n_chunks = tile_n // sub
    total_rows = num_blocks * tile_n

    # Lane-dense targets: (total_chunks, sub) int32, so the targets stream costs
    # ~4 bytes/row of HBM instead of the 512 bytes/row of an (N, 1) layout.
    t = targets.astype(jnp.int32).reshape(n)
    t = jnp.pad(t, (0, total_rows - n))
    t = t.reshape(num_blocks * n_chunks, sub)

    kernel = partial(_mce_kernel, n_total=n, tile_n=tile_n, sub_rows=sub,
                     n_chunks=n_chunks)

    c_pad = _round_up(c, _LANE)
    partials = pl.pallas_call(
        kernel,
        out_shape=jax.ShapeDtypeStruct((num_blocks, _LANE), jnp.float32),
        grid=(num_blocks,),
        in_specs=[
            pl.BlockSpec((tile_n, c), lambda i: (i, 0)),        # logits row block
            pl.BlockSpec((n_chunks, sub), lambda i: (i, 0)),    # lane-dense targets block
        ],
        out_specs=pl.BlockSpec((1, _LANE), lambda i: (i, 0)),
        compiler_params=pltpu.CompilerParams(
            dimension_semantics=("parallel",),                  # megacore sharding on v7x
            vmem_limit_bytes=32 * 1024 * 1024,                  # safe on every generation
        ),
        cost_estimate=pl.CostEstimate(
            flops=4 * n * c + 2 * n * min(c, sub),
            transcendentals=0,
            bytes_accessed=n * c_pad * itemsize + n * 4 + num_blocks * _LANE * 4,
        ),
    )(inputs, t)

    total_incorrect = jnp.sum(partials[:, 0])      # exact integer-valued f32 count
    if reduction == "sum":
        return total_incorrect                     # == mean * N exactly
    return total_incorrect / jnp.float32(n)        # 'mean' and any other reduction


def _mce_ref(inputs, targets, reduction="mean"):
    pred = jnp.argmax(inputs, axis=1)
    loss = jnp.mean((pred != targets).astype(jnp.float32))
    if reduction == "sum":
        return loss * inputs.shape[0]
    return loss


if __name__ == "__main__":
    key = jax.random.PRNGKey(0)
    k1, k2, k3, k4, k5, k6 = jax.random.split(key, 6)

    # Case 1: float32, single block.
    N, C = 64, 32
    x1 = jax.random.normal(k1, (N, C), dtype=jnp.float32)
    y1 = jax.random.randint(k2, (N,), 0, C, dtype=jnp.int32)
    out = jax.block_until_ready(mce_loss(x1, y1, reduction="mean"))
    ref = _mce_ref(x1, y1, reduction="mean")
    assert jnp.allclose(out, ref, atol=1e-6), (out, ref)
    out_s = jax.block_until_ready(mce_loss(x1, y1, reduction="sum"))
    ref_s = _mce_ref(x1, y1, reduction="sum")
    assert jnp.allclose(out_s, ref_s, atol=1e-6), (out_s, ref_s)

    # Case 2: bf16 logits (no wrapper upcast), N not a multiple of 8
    # (exercises the padded-row mask).
    N2, C2 = 13, 10
    x2 = jax.random.normal(k3, (N2, C2), dtype=jnp.bfloat16)
    y2 = jax.random.randint(k4, (N2,), 0, C2, dtype=jnp.int32)
    out2 = jax.block_until_ready(mce_loss(x2, y2))
    ref2 = _mce_ref(x2, y2)
    assert jnp.allclose(out2, ref2, atol=1e-6), (out2, ref2)

    # Case 3: multiple grid blocks, multiple inner chunks, partial tail block.
    N3, C3 = 1000, 16
    x3 = jax.random.normal(k5, (N3, C3), dtype=jnp.float32)
    y3 = jax.random.randint(k6, (N3,), 0, C3, dtype=jnp.int32)
    out3 = jax.block_until_ready(mce_loss(x3, y3, block_rows=256, sub_rows=128))
    ref3 = _mce_ref(x3, y3)
    assert jnp.allclose(out3, ref3, atol=1e-6), (out3, ref3)
    # Default tiling on the same inputs (exercises the >=2-block v7x split).
    out3b = jax.block_until_ready(mce_loss(x3, y3))
    assert jnp.allclose(out3b, ref3, atol=1e-6), (out3b, ref3)

    print("KERNEL_OK")
</pallas_src>

<mosaic_0001>
module attributes {stable_mosaic.version = 11 : i64} {
  func.func @_mce_kernel(%arg0: i32, %arg1: memref<64x32xf32, #tpu.memory_space<vmem>>, %arg2: memref<1x64xi32, #tpu.memory_space<vmem>>, %arg3: memref<1x128xf32, #tpu.memory_space<vmem>>) attributes {dimension_semantics = [#tpu.dimension_semantics<parallel>], iteration_bounds = array<i64: 1>, scalar_prefetch = 0 : i64, scratch_operands = 0 : i64, tpu.core_type = #tpu.core_type<tc>, window_params = [{transform_indices = @transform_0, window_bounds = array<i64: 64, 32>}, {transform_indices = @transform_1, window_bounds = array<i64: 1, 64>}, {transform_indices = @transform_2, window_bounds = array<i64: 1, 128>}]} {
    %c64_i32 = arith.constant 64 : i32
    %0 = arith.muli %arg0, %c64_i32 : i32
    %1 = tpu.iota {dimensions = array<i32: 1>} : vector<64x32xi32>
    %2 = tpu.iota {dimensions = array<i32: 0>} : vector<32x64xi32>
    %3 = tpu.iota {dimensions = array<i32: 1>} : vector<1x64xi32>
    %4 = tpu.iota {dimensions = array<i32: 0>} : vector<32x32xi32>
    %5 = tpu.iota {dimensions = array<i32: 1>} : vector<32x32xi32>
    %6 = arith.cmpi eq, %4, %5 : vector<32x32xi32>
    %7 = arith.extui %6 : vector<32x32xi1> to vector<32x32xi32>
    %8 = arith.sitofp %7 : vector<32x32xi32> to vector<32x32xf32>
    %cst = arith.constant 0.000000e+00 : f32
    %9 = vector.broadcast %cst : f32 to vector<1x1xf32>
    %c0_i32 = arith.constant 0 : i32
    %c64_i32_0 = arith.constant 64 : i32
    %10 = arith.muli %c0_i32, %c64_i32_0 : i32
    %11 = tpu.assume_multiple %10, 64 : i32
    %12 = arith.index_cast %11 : i32 to index
    %c0 = arith.constant 0 : index
    %13 = vector.load %arg1[%12, %c0] : memref<64x32xf32, #tpu.memory_space<vmem>>, vector<64x32xf32>
    %14 = arith.index_cast %c0_i32 : i32 to index
    %c0_1 = arith.constant 0 : index
    %15 = vector.load %arg2[%14, %c0_1] : memref<1x64xi32, #tpu.memory_space<vmem>>, vector<1x64xi32>
    %cst_2 = arith.constant dense<0xFF800000> : vector<64xf32>
    %16 = vector.multi_reduction <maximumf>, %13, %cst_2 [1] : vector<64x32xf32> to vector<64xf32>
    %17 = vector.shape_cast %16 : vector<64xf32> to vector<64x1xf32>
    %18 = vector.broadcast %17 : vector<64x1xf32> to vector<64x32xf32>
    %19 = arith.cmpf oeq, %13, %18 : vector<64x32xf32>
    %c32_i32 = arith.constant 32 : i32
    %20 = vector.broadcast %c32_i32 : i32 to vector<64x32xi32>
    %21 = arith.select %19, %1, %20 : vector<64x32xi1>, vector<64x32xi32>
    %cst_3 = arith.constant dense<2147483647> : vector<64xi32>
    %22 = vector.multi_reduction <minsi>, %21, %cst_3 [1] : vector<64x32xi32> to vector<64xi32>
    %23 = vector.shape_cast %22 : vector<64xi32> to vector<64x1xi32>
    %24 = arith.addi %0, %11 : i32
    %25 = vector.broadcast %24 : i32 to vector<1x64xi32>
    %26 = arith.addi %25, %3 : vector<1x64xi32>
    %c64_i32_4 = arith.constant 64 : i32
    %27 = vector.broadcast %c64_i32_4 : i32 to vector<1x64xi32>
    %28 = arith.cmpi slt, %26, %27 : vector<1x64xi32>
    %29 = vector.broadcast %23 : vector<64x1xi32> to vector<64x32xi32>
    %30 = arith.cmpi eq, %1, %29 : vector<64x32xi32>
    %31 = arith.extui %30 : vector<64x32xi1> to vector<64x32xi32>
    %32 = arith.sitofp %31 : vector<64x32xi32> to vector<64x32xf32>
    %33 = vector.broadcast %15 : vector<1x64xi32> to vector<32x64xi32>
    %34 = arith.cmpi eq, %2, %33 : vector<32x64xi32>
    %35 = vector.broadcast %28 : vector<1x64xi1> to vector<32x64xi1>
    %36 = arith.andi %34, %35 : vector<32x64xi1>
    %37 = arith.extui %36 : vector<32x64xi1> to vector<32x64xi32>
    %38 = arith.sitofp %37 : vector<32x64xi32> to vector<32x64xf32>
    %cst_5 = arith.constant dense<0.000000e+00> : vector<32x32xf32>
    %39 = tpu.matmul %38, %32, %cst_5 {dimension_numbers = #tpu.dot_dimension_numbers<[1], [0], [0], [1], [0, 0, 1, 1], [], []>} : vector<32x64xf32>, vector<64x32xf32>, vector<32x32xf32> -> vector<32x32xf32>
    %40 = arith.mulf %39, %8 : vector<32x32xf32>
    %cst_6 = arith.constant dense<0.000000e+00> : vector<32xf32>
    %41 = vector.multi_reduction <add>, %40, %cst_6 [0] : vector<32x32xf32> to vector<32xf32>
    %42 = vector.shape_cast %41 : vector<32xf32> to vector<1x32xf32>
    %cst_7 = arith.constant dense<0.000000e+00> : vector<1xf32>
    %43 = vector.multi_reduction <add>, %42, %cst_7 [1] : vector<1x32xf32> to vector<1xf32>
    %44 = vector.shape_cast %43 : vector<1xf32> to vector<1x1xf32>
    %45 = arith.extui %28 : vector<1x64xi1> to vector<1x64xi32>
    %46 = arith.sitofp %45 : vector<1x64xi32> to vector<1x64xf32>
    %cst_8 = arith.constant dense<0.000000e+00> : vector<1xf32>
    %47 = vector.multi_reduction <add>, %46, %cst_8 [1] : vector<1x64xf32> to vector<1xf32>
    %48 = vector.shape_cast %47 : vector<1xf32> to vector<1x1xf32>
    %49 = arith.subf %48, %44 : vector<1x1xf32>
    %50 = arith.addf %9, %49 : vector<1x1xf32>
    %c1_i32 = arith.constant 1 : i32
    %cst_9 = arith.constant 0.000000e+00 : f32
    %51 = vector.broadcast %cst_9 : f32 to vector<1x128xf32>
    %52 = vector.broadcast %50 : vector<1x1xf32> to vector<1x128xf32>
    %53 = arith.addf %51, %52 : vector<1x128xf32>
    %c0_10 = arith.constant 0 : index
    %c0_11 = arith.constant 0 : index
    %54 = vector.load %arg3[%c0_10, %c0_11] : memref<1x128xf32, #tpu.memory_space<vmem>>, vector<1x128xf32>
    tpu.vector_store %arg3[%c0_10, %c0_11], %53 {strides = array<i32>} : memref<1x128xf32, #tpu.memory_space<vmem>>, vector<1x128xf32>,
    return
  }
  func.func @transform_0(%arg0: i32) -> (i32, i32) {
    %c0_i32 = arith.constant 0 : i32
    %c0_i32_0 = arith.constant 0 : i32
    return %arg0, %c0_i32 : i32, i32
  }
  func.func @transform_1(%arg0: i32) -> (i32, i32) {
    %c0_i32 = arith.constant 0 : i32
    %c0_i32_0 = arith.constant 0 : i32
    return %arg0, %c0_i32 : i32, i32
  }
  func.func @transform_2(%arg0: i32) -> (i32, i32) {
    %c0_i32 = arith.constant 0 : i32
    %c0_i32_0 = arith.constant 0 : i32
    return %arg0, %c0_i32 : i32, i32
  }
}

</mosaic_0001>

<bundles_post_ra>
// kernel: tpu_custom_call.1
= control target key start
LH: loop header
LB: loop body
LE: loop exit
PB: predicated region body
PF: predicated region fallthrough
CT: control target
= control target key end

     0   :  { %vm41_vm0 = vcmask 261120   ;;  %s593_s0 = inlined_call_operand.vmem [shape: f32[64,32], index: 0, kind: input, shape index: {}]   ;;  %s594_s1 = inlined_call_operand.vmem [shape: s32[1,64], index: 1, kind: input, shape index: {}]   ;;  %s595_s2 = inlined_call_operand.hbm [shape: f32[1,128], index: 2, kind: output, shape index: {}]  }
   0x1   :  { %v39_v0 = vld [vmem:[%s593_s0 + $0x38] sm:$0xff]  ;;  %v37_v1 = vld [vmem:[%s593_s0 + $0x28] sm:$0xff] }
   0x2   :  { %v35_v2 = vld [vmem:[%s593_s0 + $0x18] sm:$0xff]  ;;  %v63_v3 = vsel %vm41_vm0, %v39_v0, -inf  ;;  %v57_v4 = vsel %vm41_vm0, %v37_v1, -inf }
   0x3   :  { %v51_v5 = vsel %vm41_vm0, %v35_v2, -inf  ;;  %64 = vmax.xlane.f32.xlu0 %v63_v3  ;;  %58 = vmax.xlane.f32.xlu1 %v57_v4 }
   0x4   :  { %52 = vmax.xlane.f32.xlu2 %v51_v5 }
   0x5   :  { %7 = vsyncpa [#allocation3], 0  ;;  %v38_v6 = vld [vmem:[%s593_s0 + $0x30] sm:$0xff]  ;;  %v36_v7 = vld [vmem:[%s593_s0 + $0x20] sm:$0xff]  ;;  %v13_v16 = vlaneseq  ;;  %s326_s29 = sshll.u32 %s595_s2, 4  ;;  %s327_s29 = int_to_ptr.hbm [resolvable:$true] %s326_s29 }
   0x6   :  { %v34_v8 = vld [vmem:[%s593_s0 + $0x10] sm:$0xff]  ;;  %v60_v9 = vsel %vm41_vm0, %v38_v6, -inf  ;;  %v54_v10 = vsel %vm41_vm0, %v36_v7, -inf  ;;  %v33_v12 = vld [vmem:[%s593_s0 + $0x8] sm:$0xff]  ;;  %v32_v13 = vld [vmem:[%s593_s0] sm:$0xff] }
   0x7   :  { %v48_v11 = vsel %vm41_vm0, %v34_v8, -inf  ;;  %v45_v14 = vsel %vm41_vm0, %v33_v12, -inf  ;;  %v42_v15 = vsel %vm41_vm0, %v32_v13, -inf  ;;  %v469_v17 = vand.u32 127, %v13_v16 }
   0xb   :  { %61 = vmax.xlane.f32.xlu0 %v60_v9  ;;  %55 = vmax.xlane.f32.xlu1 %v54_v10 }
   0xc   :  { %49 = vmax.xlane.f32.xlu2 %v48_v11 }
  0x13   :  { %46 = vmax.xlane.f32.xlu0 %v45_v14  ;;  %43 = vmax.xlane.f32.xlu1 %v42_v15 }
  0x76   :  { %v65_v18 = vpop.xlane.xlu0 %64  ;;  %v59_v19 = vpop.xlane.xlu1 %58 }
  0x77   :  { %vm73_vm1 = vcmp.eq.f32.partialorder %v39_v0, %v65_v18  ;;  %vm71_vm2 = vcmp.eq.f32.partialorder %v37_v1, %v59_v19  ;;  %v53_v20 = vpop.xlane.xlu2 %52 }
  0x78   :  { %v81_v21 = vsel %vm73_vm1, %v469_v17, 32  ;;  %v79_v22 = vsel %vm71_vm2, %v469_v17, 32  ;;  %vm69_vm3 = vcmp.eq.f32.partialorder %v35_v2, %v53_v20 }
  0x79   :  { %v187_v23 = vsel %vm41_vm0, %v81_v21, 2147483647  ;;  %v157_v24 = vsel %vm41_vm0, %v79_v22, 2147483647  ;;  %v77_v37 = vsel %vm69_vm3, %v469_v17, 32 }
  0x7a   :  { %v189_v25 = vshra.s32 %v187_v23, 16  ;;  %v159_v26 = vshra.s32 %v157_v24, 16  ;;  %v127_v44 = vsel %vm41_vm0, %v77_v37, 2147483647  ;;  %v188_v58 = vand.u32 65535, %v187_v23 }
  0x7b   :  { %v129_v50 = vshra.s32 %v127_v44, 16  ;;  %v158_v59 = vand.u32 65535, %v157_v24  ;;  %v128_v14 = vand.u32 65535, %v127_v44 }
  0x7c   :  { %v191_v27 = vcvt.s32.f32 %v189_v25  ;;  %v161_v28 = vcvt.s32.f32 %v159_v26  ;;  %v190_v62 = vcvt.s32.f32 %v188_v58 }
  0x7d   :  { %v131_v54 = vcvt.s32.f32 %v129_v50  ;;  %v160_v63 = vcvt.s32.f32 %v158_v59  ;;  %v130_v20 = vcvt.s32.f32 %v128_v14 }
  0x7e   :  { %v62_v29 = vpop.xlane.xlu0 %61  ;;  %v56_v30 = vpop.xlane.xlu1 %55  ;;  %192 = vmin.xlane.f32.xlu2 %v191_v27  ;;  %162 = vmin.xlane.f32.xlu1 %v161_v28 }
  0x7f   :  { %vm72_vm4 = vcmp.eq.f32.partialorder %v38_v6, %v62_v29  ;;  %vm70_vm5 = vcmp.eq.f32.partialorder %v36_v7, %v56_v30  ;;  %v50_v31 = vpop.xlane.xlu2 %49 }
  0x80   :  { %v80_v32 = vsel %vm72_vm4, %v469_v17, 32  ;;  %v78_v33 = vsel %vm70_vm5, %v469_v17, 32  ;;  %vm68_vm6 = vcmp.eq.f32.partialorder %v34_v8, %v50_v31 }
  0x81   :  { %v172_v34 = vsel %vm41_vm0, %v80_v32, 2147483647  ;;  %v142_v35 = vsel %vm41_vm0, %v78_v33, 2147483647  ;;  %v76_v36 = vsel %vm68_vm6, %v469_v17, 32 }
  0x82   :  { %v112_v38 = vsel %vm41_vm0, %v76_v36, 2147483647  ;;  %v174_v39 = vshra.s32 %v172_v34, 16  ;;  %v144_v40 = vshra.s32 %v142_v35, 16  ;;  %v143_v2 = vand.u32 65535, %v142_v35 }
  0x83   :  { %v114_v41 = vshra.s32 %v112_v38, 16  ;;  %v173_v3 = vand.u32 65535, %v172_v34  ;;  %v113_v4 = vand.u32 65535, %v112_v38  ;;  %v418_v36 = vmov 1.0  }
  0x84   :  { %v176_v42 = vcvt.s32.f32 %v174_v39  ;;  %v146_v43 = vcvt.s32.f32 %v144_v40  ;;  %v145_v7 = vcvt.s32.f32 %v143_v2 }
  0x85   :  { %v116_v45 = vcvt.s32.f32 %v114_v41  ;;  %v175_v8 = vcvt.s32.f32 %v173_v3  ;;  %v115_v10 = vcvt.s32.f32 %v113_v4 }
  0x86   :  { %v47_v46 = vpop.xlane.xlu0 %46  ;;  %177 = vmin.xlane.f32.xlu0 %v176_v42  ;;  %147 = vmin.xlane.f32.xlu2 %v146_v43  ;;  %v44_v47 = vpop.xlane.xlu1 %43 }
  0x87   :  { %vm67_vm7 = vcmp.eq.f32.partialorder %v33_v12, %v47_v46  ;;  %117 = vmin.xlane.f32.xlu1 %v116_v45  ;;  %vm66_vm8 = vcmp.eq.f32.partialorder %v32_v13, %v44_v47 }
  0x88   :  { %v75_v48 = vsel %vm67_vm7, %v469_v17, 32  ;;  %v74_v49 = vsel %vm66_vm8, %v469_v17, 32  ;;  %vm205_vm7 = vcmp.lt.s32.totalorder %v469_v17, 64 }
  0x89   :  { %v97_v51 = vsel %vm41_vm0, %v75_v48, 2147483647  ;;  %v82_v53 = vsel %vm41_vm0, %v74_v49, 2147483647 }
  0x8a   :  { %v99_v52 = vshra.s32 %v97_v51, 16  ;;  %v84_v56 = vshra.s32 %v82_v53, 16  ;;  %v98_v15 = vand.u32 65535, %v97_v51  ;;  %v83_v24 = vand.u32 65535, %v82_v53 }
  0x8c   :  { %v101_v55 = vcvt.s32.f32 %v99_v52  ;;  %v86_v57 = vcvt.s32.f32 %v84_v56  ;;  %v100_v21 = vcvt.s32.f32 %v98_v15  ;;  %v85_v26 = vcvt.s32.f32 %v83_v24 }
  0x8d   :  { %v508_v52 = vshrl.u32 %v13_v16, 7 }
  0x8e   :  { %132 = vmin.xlane.f32.xlu0 %v131_v54  ;;  %102 = vmin.xlane.f32.xlu2 %v101_v55 }
  0x8f   :  { %v17_v3 = vadd.s32 8, %v508_v52 }
  0x96   :  { %87 = vmin.xlane.f32.xlu0 %v86_v57 }
  0xf1   :  { %v193_v60 = vpop.xlane.xlu2 %192  ;;  %v487_v61 = vpop.xlane.xlu1 %162 }
  0xf2   :  { %vm194_vm9 = vcmp.eq.f32.partialorder %v191_v27, %v193_v60  ;;  %vm164_vm10 = vcmp.eq.f32.partialorder %v161_v28, %v487_v61  ;;  %v199_v28 = vcvt.f32.s32 %v193_v60  ;;  %v169_v34 = vcvt.f32.s32 %v487_v61  ;;  %v391_v61 = vld [vmem:[%s594_s1] ss:$0 sm:$0xff]  ;;  %s420_s1 = smov [#allocation2]  }
  0xf3   :  { %v195_v0 = vsel %vm194_vm9, %v190_v62, inf  ;;  %v165_v1 = vsel %vm164_vm10, %v160_v63, inf  ;;  %v522_v60 = vadd.s32 16, %v508_v52  ;;  %v530_v62 = vadd.s32 24, %v508_v52  ;;  %s324_s26 = sshll.u32 %s420_s1, 4  ;;  %s325_s26 = int_to_ptr.vmem [resolvable:$true] %s324_s26 }
  0xf4   :  { %196 = vmin.xlane.f32.xlu1 %v195_v0  ;;  %166 = vmin.xlane.f32.xlu0 %v165_v1  ;;  %v200_v30 = vshll.u32 %v199_v28, 16  ;;  %v170_v41 = vshll.u32 %v169_v34, 16 }
  0xf5   :  { %vm233_vm8 = vcmp.eq.s32.totalorder %v522_v60, %v391_v61  ;;  %vm234_vm9 = vcmp.eq.s32.totalorder %v530_v62, %v391_v61 }
  0xf9   :  { %v178_v5 = vpop.xlane.xlu0 %177  ;;  %v148_v6 = vpop.xlane.xlu2 %147 }
  0xfa   :  { %v490_v9 = vpop.xlane.xlu1 %117  ;;  %vm149_vm11 = vcmp.eq.f32.partialorder %v146_v43, %v148_v6  ;;  %vm179_vm12 = vcmp.eq.f32.partialorder %v176_v42, %v178_v5  ;;  %v184_v35 = vcvt.f32.s32 %v178_v5  ;;  %v154_v37 = vcvt.f32.s32 %v148_v6 }
  0xfb   :  { %v150_v11 = vsel %vm149_vm11, %v145_v7, inf  ;;  %v180_v12 = vsel %vm179_vm12, %v175_v8, inf  ;;  %vm119_vm13 = vcmp.eq.f32.partialorder %v116_v45, %v490_v9  ;;  %v124_v48 = vcvt.f32.s32 %v490_v9  ;;  %vm550_vm12 = vmand %vm233_vm8, %vm205_vm7 }
  0xfc   :  { %151 = vmin.xlane.f32.xlu1 %v150_v11  ;;  %181 = vmin.xlane.f32.xlu2 %v180_v12  ;;  %v120_v13 = vsel %vm119_vm13, %v115_v10, inf  ;;  %v185_v42 = vshll.u32 %v184_v35, 16  ;;  %v155_v45 = vshll.u32 %v154_v37, 16  ;;  %vm231_vm11 = vcmp.eq.s32.totalorder %v508_v52, %v391_v61 }
  0xfd   :  { %121 = vmin.xlane.f32.xlu0 %v120_v13  ;;  %vm232_vm13 = vcmp.eq.s32.totalorder %v17_v3, %v391_v61  ;;  %v419_v10 = vmov 0.0   ;;  %vm22_vm8 = vcmp.eq.s32.totalorder %v522_v60, %v469_v17 }
  0xfe   :  { %v349_v11 = vsel %vm550_vm12, 1.0, %v419_v10  ;;  %v363_v15 = vsel %vm205_vm7, 1.0, %v419_v10 }
 0x101   :  { %v133_v18 = vpop.xlane.xlu0 %132  ;;  %v493_v19 = vpop.xlane.xlu2 %102 }
 0x102   :  { %vm134_vm14 = vcmp.eq.f32.partialorder %v131_v54, %v133_v18  ;;  %vm104_vm15 = vcmp.eq.f32.partialorder %v101_v55, %v493_v19  ;;  %v139_v49 = vcvt.f32.s32 %v133_v18  ;;  %v109_v53 = vcvt.f32.s32 %v493_v19 }
 0x103   :  { %v135_v22 = vsel %vm134_vm14, %v130_v20, inf  ;;  %v105_v23 = vsel %vm104_vm15, %v100_v21, inf  ;;  %v125_v55 = vshll.u32 %v124_v48, 16  ;;  %vm240_vm15 = vmand %vm234_vm9, %vm205_vm7  ;;  %vm23_vm9 = vcmp.eq.s32.totalorder %v530_v62, %v469_v17 }
 0x104   :  { %136 = vmin.xlane.f32.xlu2 %v135_v22  ;;  %106 = vmin.xlane.f32.xlu1 %v105_v23  ;;  %v140_v56 = vshll.u32 %v139_v49, 16  ;;  %v110_v63 = vshll.u32 %v109_v53, 16  ;;  %v350_v12 = vsel %vm240_vm15, 1.0, %v419_v10  ;;  %v338_v28 = vsel %vm23_vm9, 1.0, %v419_v10 }
 0x109   :  { %v496_v25 = vpop.xlane.xlu0 %87 }
 0x10a   :  { %vm89_vm1 = vcmp.eq.f32.partialorder %v86_v57, %v496_v25  ;;  %v94_v2 = vcvt.f32.s32 %v496_v25 }
 0x10b   :  { %v90_v27 = vsel %vm89_vm1, %v85_v26, inf  ;;  %vm237_vm1 = vmand %vm231_vm11, %vm205_vm7 }
 0x10c   :  { %91 = vmin.xlane.f32.xlu2 %v90_v27  ;;  %v95_v7 = vshll.u32 %v94_v2, 16  ;;  %v347_v13 = vsel %vm237_vm1, 1.0, %v419_v10  ;;  %v337_v27 = vsel %vm22_vm8, 1.0, %v419_v10 }
 0x167   :  { %v197_v29 = vpop.xlane.xlu1 %196  ;;  %v167_v32 = vpop.xlane.xlu0 %166 }
 0x168   :  { %v198_v31 = vcvt.f32.s32 %v197_v29  ;;  %v168_v38 = vcvt.f32.s32 %v167_v32 }
 0x16a   :  { %v201_v33 = vadd.s32 %v200_v30, %v198_v31  ;;  %v171_v46 = vadd.s32 %v170_v41, %v168_v38 }
 0x16c   :  { %vm213_vm2 = vcmp.eq.s32.totalorder %v469_v17, %v201_v33  ;;  %vm211_vm4 = vcmp.eq.s32.totalorder %v469_v17, %v171_v46 }
 0x16d   :  { %351 = vmatpush.msk.msra.mxu0 %vm213_vm2, %v418_v36  ;;  %364 = vmatpush.msk.msra.mxu1 %vm213_vm2, %v418_v36 }
 0x16e   :  { %365 = vmatpush.msk.msra.mxu2 %vm213_vm2, %v418_v36  ;;  %366 = vmatpush.msk.msra.mxu3 %vm213_vm2, %v418_v36  ;;  %vm238_vm2 = vmand %vm232_vm13, %vm205_vm7 }
 0x16f   :  { %v152_v39 = vpop.xlane.xlu1 %151  ;;  %v182_v40 = vpop.xlane.xlu2 %181  ;;  %v348_v14 = vsel %vm238_vm2, 1.0, %v419_v10 }
 0x170   :  { %v153_v43 = vcvt.f32.s32 %v152_v39  ;;  %v183_v44 = vcvt.f32.s32 %v182_v40  ;;  %v122_v50 = vpop.xlane.xlu0 %121 }
 0x171   :  { %v123_v54 = vcvt.f32.s32 %v122_v50 }
 0x172   :  { %v186_v47 = vadd.s32 %v185_v42, %v183_v44  ;;  %v156_v51 = vadd.s32 %v155_v45, %v153_v43 }
 0x173   :  { %v126_v0 = vadd.s32 %v125_v55, %v123_v54 }
 0x174   :  { %vm212_vm3 = vcmp.eq.s32.totalorder %v469_v17, %v186_v47  ;;  %vm210_vm5 = vcmp.eq.s32.totalorder %v469_v17, %v156_v51 }
 0x175   :  { %352 = vmatpush.msk.msra.mxu0 %vm212_vm3, %v418_v36  ;;  %367 = vmatpush.msk.msra.mxu1 %vm212_vm3, %v418_v36  ;;  %vm208_vm10 = vcmp.eq.s32.totalorder %v469_v17, %v126_v0 }
 0x176   :  { %368 = vmatpush.msk.msra.mxu2 %vm212_vm3, %v418_v36  ;;  %369 = vmatpush.msk.msra.mxu3 %vm212_vm3, %v418_v36 }
 0x177   :  { %v137_v57 = vpop.xlane.xlu2 %136  ;;  %v107_v58 = vpop.xlane.xlu1 %106  ;;  %353 = vmatpush.msk.msra.mxu0 %vm211_vm4, %v418_v36  ;;  %370 = vmatpush.msk.msra.mxu1 %vm211_vm4, %v418_v36 }
 0x178   :  { %v138_v16 = vcvt.f32.s32 %v137_v57  ;;  %v108_v59 = vcvt.f32.s32 %v107_v58  ;;  %371 = vmatpush.msk.msra.mxu2 %vm211_vm4, %v418_v36  ;;  %372 = vmatpush.msk.msra.mxu3 %vm211_vm4, %v418_v36  ;;  %vm249_vm4 = vcmask 523264  }
 0x179   :  { %354 = vmatpush.msk.msra.mxu0 %vm210_vm5, %v418_v36  ;;  %373 = vmatpush.msk.msra.mxu1 %vm210_vm5, %v418_v36  ;;  %v312_v18 = vsel %vm249_vm4, %v363_v15, 0.0 }
 0x17a   :  { %v141_v1 = vadd.s32 %v140_v56, %v138_v16  ;;  %374 = vmatpush.msk.msra.mxu2 %vm210_vm5, %v418_v36  ;;  %375 = vmatpush.msk.msra.mxu3 %vm210_vm5, %v418_v36  ;;  %v111_v4 = vadd.s32 %v110_v63, %v108_v59  ;;  %vm20_vm5 = vcmp.eq.s32.totalorder %v508_v52, %v469_v17 }
 0x17b   :  { %313 = vadd.xlane.f32.xlu1 %v312_v18  ;;  %v335_v19 = vsel %vm20_vm5, 1.0, %v419_v10 }
 0x17c   :  { %vm209_vm6 = vcmp.eq.s32.totalorder %v469_v17, %v141_v1  ;;  %vm207_vm14 = vcmp.eq.s32.totalorder %v469_v17, %v111_v4 }
 0x17d   :  { %355 = vmatpush.msk.msra.mxu0 %vm209_vm6, %v418_v36  ;;  %376 = vmatpush.msk.msra.mxu1 %vm209_vm6, %v418_v36 }
 0x17e   :  { %377 = vmatpush.msk.msra.mxu2 %vm209_vm6, %v418_v36  ;;  %378 = vmatpush.msk.msra.mxu3 %vm209_vm6, %v418_v36  ;;  %vm21_vm6 = vcmp.eq.s32.totalorder %v17_v3, %v469_v17 }
 0x17f   :  { %356 = vmatpush.msk.msra.mxu0 %vm208_vm10, %v418_v36  ;;  %379 = vmatpush.msk.msra.mxu1 %vm208_vm10, %v418_v36  ;;  %v92_v5 = vpop.xlane.xlu2 %91  ;;  %v336_v20 = vsel %vm21_vm6, 1.0, %v419_v10 }
 0x180   :  { %380 = vmatpush.msk.msra.mxu2 %vm208_vm10, %v418_v36  ;;  %381 = vmatpush.msk.msra.mxu3 %vm208_vm10, %v418_v36  ;;  %v93_v8 = vcvt.f32.s32 %v92_v5 }
 0x181   :  { %357 = vmatpush.msk.msra.mxu0 %vm207_vm14, %v418_v36  ;;  %382 = vmatpush.msk.msra.mxu1 %vm207_vm14, %v418_v36 }
 0x182   :  { %v96_v9 = vadd.s32 %v95_v7, %v93_v8  ;;  %383 = vmatpush.msk.msra.mxu2 %vm207_vm14, %v418_v36  ;;  %384 = vmatpush.msk.msra.mxu3 %vm207_vm14, %v418_v36 }
 0x184   :  { %vm206_vm3 = vcmp.eq.s32.totalorder %v469_v17, %v96_v9 }
 0x185   :  { %358 = vmatpush.msk.msra.mxu0 %vm206_vm3, %v418_v36  ;;  %385 = vmatpush.msk.msra.mxu1 %vm206_vm3, %v418_v36 }
 0x186   :  { %386 = vmatpush.msk.msra.mxu2 %vm206_vm3, %v418_v36  ;;  %387 = vmatpush.msk.msra.mxu3 %vm206_vm3, %v418_v36 }
 0x187   :  { %361 = vmatmul.msk.f32.vlgmr.msra.gmra.mxu2 %vm249_vm4, %v349_v11  ;;  %362 = vmatmul.msk.f32.vlgmr.msra.gmra.mxu3 %vm249_vm4, %v350_v12 }
 0x188   :  { %359 = vmatmul.msk.f32.vlgmr.msra.gmra.mxu0 %vm249_vm4, %v347_v13  ;;  %360 = vmatmul.msk.f32.vlgmr.msra.gmra.mxu1 %vm249_vm4, %v348_v14 }
 0x1ee   :  { %v314_v44 = vpop.xlane.xlu1 %313 }
 0x205   :  { %v279_v21 = vpop.f32.mrf.mxu0  ;;  %v282_v22 = vpop.f32.mrf.mxu1 }
 0x206   :  { %v291_v23 = vmul.f32 %v335_v19, %v279_v21  ;;  %v292_v24 = vmul.f32 %v336_v20, %v282_v22 }
 0x208   :  { %v295_v25 = vsel %vm41_vm0, %v291_v23, 0.0  ;;  %v296_v26 = vsel %vm41_vm0, %v292_v24, 0.0 }
 0x209   :  { %v297_v29 = vadd.f32 %v296_v26, %v295_v25 }
 0x20a   :  { %v285_v30 = vpop.f32.mrf.mxu2  ;;  %v288_v31 = vpop.f32.mrf.mxu3 }
 0x20b   :  { %v293_v32 = vmul.f32 %v337_v27, %v285_v30  ;;  %v294_v33 = vmul.f32 %v338_v28, %v288_v31 }
 0x20d   :  { %v298_v34 = vsel %vm41_vm0, %v293_v32, 0.0  ;;  %v300_v35 = vsel %vm41_vm0, %v294_v33, 0.0 }
 0x20e   :  { %v299_v36 = vadd.f32 %v298_v34, %v297_v29 }
 0x210   :  { %v301_v37 = vadd.f32 %v300_v35, %v299_v36 }
 0x212   :  { %v302_v17 = vrot.slane %v301_v37, 4 }
 0x214   :  { %v303_v38 = vadd.f32 %v302_v17, %v301_v37 }
 0x216   :  { %v304_v39 = vrot.slane %v303_v38, 2 }
 0x218   :  { %v305_v40 = vadd.f32 %v304_v39, %v303_v38 }
 0x21a   :  { %v306_v41 = vrot.slane %v305_v40, 1 }
 0x21c   :  { %v307_v42 = vadd.f32 %v306_v41, %v305_v40 }
 0x21e   :  { %v308_v43 = vsel %vm41_vm0, %v307_v42, 0.0 }
 0x21f   :  { %309 = vadd.xlane.f32.xlu0 %v308_v43 }
 0x292   :  { %v310_v45 = vpop.xlane.xlu0 %309 }
 0x293   :  { %v315_v46 = vsub.f32 %v314_v44, %v310_v45 }
 0x295   :  { %318 = vst [vmem:[#allocation2] sm:$0x1] %v315_v46 }
 0x296   :  { %329 = dma.vmem_to_hbm [thread:$0]  %s325_s26, 16, %s327_s29, [#allocation3]  }
 0x297   :  { %416 = dma.done.wait [#allocation3], 16  }
 0x298   :  { %417 = vsyncadd [#allocation3], 4294967280 }
 0x299   :  { %334 = vsyncpa [#allocation3], 1 }

</bundles_post_ra>
